<compile_context>
chip_gen: v7x
topology: tpu7x:2x2x1
jax: 0.10.0
libtpu: 0.0.40
codegen_flags: <defaults>
</compile_context>

<pallas_src>
import functools

import jax
import jax.numpy as jnp
from jax.experimental import pallas as pl
from jax.experimental.pallas import tpu as pltpu

TM = 512                      # row tile for [M, C] matmul-style launches
VMEM_LIMIT = 32 * 1024 * 1024 # explicit scoped-VMEM request (safe on v5e/v6e/v7x)

CPARAMS_1D = pltpu.CompilerParams(
    dimension_semantics=("parallel",), vmem_limit_bytes=VMEM_LIMIT)


# ----------------------------------------------------------------------------
# Pallas kernels
# ----------------------------------------------------------------------------
def _mm_bias_kernel(a_ref, w_ref, b_ref, o_ref, *, relu):
    # a: (TM, K) bf16, w: (K, Cout) bf16 (BN scale pre-folded), b: (1, Cout) f32
    acc = jnp.dot(a_ref[...], w_ref[...], preferred_element_type=jnp.float32)
    y = acc + b_ref[...]
    if relu:
        y = jnp.maximum(y, 0.0)
    o_ref[...] = y.astype(o_ref.dtype)


def _mm_bias_residual_relu_kernel(a_ref, w_ref, b_ref, r_ref, o_ref):
    # fused 1x1 conv (+bias) + residual add + ReLU  (bottleneck epilogue)
    acc = jnp.dot(a_ref[...], w_ref[...], preferred_element_type=jnp.float32)
    y = acc + b_ref[...] + r_ref[...].astype(jnp.float32)
    o_ref[...] = jnp.maximum(y, 0.0).astype(o_ref.dtype)


def _conv3x3_frame_kernel(x_ref, w_ref, b_ref, o_ref, *, wp, l_out):
    # Per-frame 3x3 / stride-1 / pad-1 conv via 9 shifted slices of the
    # flattened, zero-extended padded frame; tap accumulation stays in VMEM.
    # x: (1, Lext, Cin), w: (9, Cin, Cout), b: (1, Cout), o: (1, Lout, Cout)
    ext = wp + 1
    acc = None
    for ih in range(3):
        for iw in range(3):
            off = ext + (ih - 1) * wp + (iw - 1)      # static offset
            a = x_ref[0, pl.ds(off, l_out), :]
            c = jnp.dot(a, w_ref[ih * 3 + iw], preferred_element_type=jnp.float32)
            acc = c if acc is None else acc + c
    y = jnp.maximum(acc + b_ref[...], 0.0)
    o_ref[0] = y.astype(o_ref.dtype)


def _maxpool3x3_frame_kernel(x_ref, o_ref, *, wp, l_out):
    # Dense (stride-1) 3x3 max over a flattened zero-extended padded frame.
    # Input is post-ReLU (>= 0) so zero padding is the identity for max.
    ext = wp + 1
    res = None
    for ih in range(3):
        for iw in range(3):
            off = ext + (ih - 1) * wp + (iw - 1)
            a = x_ref[0, pl.ds(off, l_out), :]
            res = a if res is None else jnp.maximum(res, a)
    o_ref[0] = res


# ----------------------------------------------------------------------------
# Wrappers (layout plumbing stays in plain JAX)
# ----------------------------------------------------------------------------
def _round_up(x, m):
    return ((x + m - 1) // m) * m


def _pad_rows_to(x, mult):
    m = x.shape[0]
    mp = _round_up(m, mult)
    if mp != m:
        x = jnp.pad(x, ((0, mp - m),) + ((0, 0),) * (x.ndim - 1))
    return x, m


def conv1x1_bn(x_nhwc, w_oihw, scale, bias, *, relu, residual=None):
    """1x1 Conv + folded BN (+ optional fused residual-add + ReLU)."""
    n, h, w, cin = x_nhwc.shape
    cout = w_oihw.shape[0]
    wm = (w_oihw.reshape(cout, cin).T * scale[None, :]).astype(jnp.bfloat16)
    b = bias.reshape(1, cout).astype(jnp.float32)
    a = x_nhwc.reshape(n * h * w, cin).astype(jnp.bfloat16)
    a, m_real = _pad_rows_to(a, TM)
    mp = a.shape[0]

    if residual is None:
        out = pl.pallas_call(
            functools.partial(_mm_bias_kernel, relu=relu),
            out_shape=jax.ShapeDtypeStruct((mp, cout), jnp.bfloat16),
            grid=(mp // TM,),
            in_specs=[pl.BlockSpec((TM, cin), lambda i: (i, 0)),
                      pl.BlockSpec((cin, cout), lambda i: (0, 0)),
                      pl.BlockSpec((1, cout), lambda i: (0, 0))],
            out_specs=pl.BlockSpec((TM, cout), lambda i: (i, 0)),
            compiler_params=CPARAMS_1D,
        )(a, wm, b)
    else:
        r = residual.reshape(n * h * w, cout).astype(jnp.bfloat16)
        r, _ = _pad_rows_to(r, TM)
        out = pl.pallas_call(
            _mm_bias_residual_relu_kernel,
            out_shape=jax.ShapeDtypeStruct((mp, cout), jnp.bfloat16),
            grid=(mp // TM,),
            in_specs=[pl.BlockSpec((TM, cin), lambda i: (i, 0)),
                      pl.BlockSpec((cin, cout), lambda i: (0, 0)),
                      pl.BlockSpec((1, cout), lambda i: (0, 0)),
                      pl.BlockSpec((TM, cout), lambda i: (i, 0))],
            out_specs=pl.BlockSpec((TM, cout), lambda i: (i, 0)),
            compiler_params=CPARAMS_1D,
        )(a, wm, b, r)
    return out[:m_real].reshape(n, h, w, cout)


def conv_bn_im2col(x_nhwc, w_oihw, scale, bias, *, stride, padding, relu):
    """General conv via bf16 im2col matmul (used only for the 7x7/s2 stem)."""
    n, h, w, cin = x_nhwc.shape
    cout, _, kh, kw = w_oihw.shape
    xp = jnp.pad(x_nhwc, ((0, 0), (padding, padding), (padding, padding), (0, 0)))
    oh = (h + 2 * padding - kh) // stride + 1
    ow = (w + 2 * padding - kw) // stride + 1
    taps = []
    for ih in range(kh):
        for iw in range(kw):
            taps.append(xp[:, ih:ih + stride * oh:stride, iw:iw + stride * ow:stride, :])
    a = jnp.stack(taps, axis=3).reshape(n * oh * ow, kh * kw * cin).astype(jnp.bfloat16)
    wm = (jnp.transpose(w_oihw, (2, 3, 1, 0)).reshape(kh * kw * cin, cout)
          * scale[None, :]).astype(jnp.bfloat16)
    b = bias.reshape(1, cout).astype(jnp.float32)

    a, m_real = _pad_rows_to(a, TM)
    mp, k = a.shape
    out = pl.pallas_call(
        functools.partial(_mm_bias_kernel, relu=relu),
        out_shape=jax.ShapeDtypeStruct((mp, cout), jnp.bfloat16),
        grid=(mp // TM,),
        in_specs=[pl.BlockSpec((TM, k), lambda i: (i, 0)),
                  pl.BlockSpec((k, cout), lambda i: (0, 0)),
                  pl.BlockSpec((1, cout), lambda i: (0, 0))],
        out_specs=pl.BlockSpec((TM, cout), lambda i: (i, 0)),
        compiler_params=CPARAMS_1D,
    )(a, wm, b)
    return out[:m_real].reshape(n, oh, ow, cout)


def _flatten_padded_frames(x_nhwc):
    """Zero-pad spatially by 1, flatten (H,W), add halo rows for shifted taps."""
    n, h, w, c = x_nhwc.shape
    hp, wp = h + 2, w + 2
    l = hp * wp
    lp = _round_up(l, 16)
    ext = wp + 1
    lext = lp + 2 * ext
    xpad = jnp.pad(x_nhwc, ((0, 0), (1, 1), (1, 1), (0, 0))).reshape(n, l, c)
    xflat = jnp.pad(xpad, ((0, 0), (ext, lext - l - ext), (0, 0))).astype(jnp.bfloat16)
    return xflat, hp, wp, l, lp, lext


def conv3x3_bn_relu(x_nhwc, w_oihw, scale, bias):
    """3x3 / stride-1 / pad-1 conv + folded BN + ReLU; no HBM im2col."""
    n, h, w, cin = x_nhwc.shape
    cout = w_oihw.shape[0]
    xflat, hp, wp, l, lp, lext = _flatten_padded_frames(x_nhwc)
    wm = (jnp.transpose(w_oihw, (2, 3, 1, 0)).reshape(9, cin, cout)
          * scale[None, None, :]).astype(jnp.bfloat16)
    b = bias.reshape(1, cout).astype(jnp.float32)

    out = pl.pallas_call(
        functools.partial(_conv3x3_frame_kernel, wp=wp, l_out=lp),
        out_shape=jax.ShapeDtypeStruct((n, lp, cout), jnp.bfloat16),
        grid=(n,),
        in_specs=[pl.BlockSpec((1, lext, cin), lambda i: (i, 0, 0)),
                  pl.BlockSpec((9, cin, cout), lambda i: (0, 0, 0)),
                  pl.BlockSpec((1, cout), lambda i: (0, 0))],
        out_specs=pl.BlockSpec((1, lp, cout), lambda i: (i, 0, 0)),
        compiler_params=CPARAMS_1D,
    )(xflat, wm, b)
    out = out[:, :l].reshape(n, hp, wp, cout)
    return out[:, 1:hp - 1, 1:wp - 1, :]


def maxpool_3x3_s2_p1(x_nhwc):
    """3x3 / stride-2 / pad-1 maxpool on a post-ReLU tensor (zero padding ok)."""
    n, h, w, c = x_nhwc.shape
    oh = (h + 2 - 3) // 2 + 1
    ow = (w + 2 - 3) // 2 + 1
    xflat, hp, wp, l, lp, lext = _flatten_padded_frames(x_nhwc)

    out = pl.pallas_call(
        functools.partial(_maxpool3x3_frame_kernel, wp=wp, l_out=lp),
        out_shape=jax.ShapeDtypeStruct((n, lp, c), jnp.bfloat16),
        grid=(n,),
        in_specs=[pl.BlockSpec((1, lext, c), lambda i: (i, 0, 0))],
        out_specs=pl.BlockSpec((1, lp, c), lambda i: (i, 0, 0)),
        compiler_params=CPARAMS_1D,
    )(xflat)
    full = out[:, :l].reshape(n, hp, wp, c)
    # stride-2 subsample: pooled output (oh, ow) = dense max at padded (2oh+1, 2ow+1)
    return full[:, 1:1 + 2 * oh:2, 1:1 + 2 * ow:2, :]


# ----------------------------------------------------------------------------
# Synthetic ResNet-50 stem + layer1 (res2) parameters
# ----------------------------------------------------------------------------
def _fold_bn(gamma, beta, mean, var, eps=1e-5):
    scale = gamma / jnp.sqrt(var + eps)
    return scale, beta - mean * scale


def init_params(key):
    keys = iter(jax.random.split(key, 64))

    def conv_w(shape):
        return 0.05 * jax.random.normal(next(keys), shape, jnp.float32)

    def bn(c):
        gamma = 1.0 + 0.1 * jax.random.normal(next(keys), (c,), jnp.float32)
        beta = 0.1 * jax.random.normal(next(keys), (c,), jnp.float32)
        mean = 0.1 * jax.random.normal(next(keys), (c,), jnp.float32)
        var = 0.5 + jnp.abs(jax.random.normal(next(keys), (c,), jnp.float32))
        return _fold_bn(gamma, beta, mean, var)

    params = {}
    params["conv1_w"] = conv_w((64, 3, 7, 7))
    params["conv1_s"], params["conv1_b"] = bn(64)

    # layer1 (res2): 3 bottlenecks, width 64, expansion 4
    blocks = []
    in_c = 64
    for b in range(3):
        blk = {}
        blk["w1"] = conv_w((64, in_c, 1, 1)); blk["s1"], blk["b1"] = bn(64)
        blk["w2"] = conv_w((64, 64, 3, 3));   blk["s2"], blk["b2"] = bn(64)
        blk["w3"] = conv_w((256, 64, 1, 1));  blk["s3"], blk["b3"] = bn(256)
        if b == 0:
            blk["wd"] = conv_w((256, in_c, 1, 1)); blk["sd"], blk["bd"] = bn(256)
        blocks.append(blk)
        in_c = 256
    params["layer1"] = blocks
    return params


# ----------------------------------------------------------------------------
# Forward pass of Two_res_spatial_res2
# ----------------------------------------------------------------------------
def two_res_spatial_res2_forward(front_image, params):
    # front_image: [B, T, 3, H, W] (NCHW per frame, matching PyTorch); the
    # python loop over dim 0 + stack is equivalent to flattening (B,T)->N.
    B, T, C, H, W = front_image.shape
    x = front_image.reshape(B * T, C, H, W)
    x = jnp.transpose(x, (0, 2, 3, 1)).astype(jnp.bfloat16)   # NCHW -> NHWC, bf16

    # stem: conv7x7/s2 + BN + ReLU, then maxpool 3x3/s2
    x = conv_bn_im2col(x, params["conv1_w"], params["conv1_s"], params["conv1_b"],
                       stride=2, padding=3, relu=True)
    x = maxpool_3x3_s2_p1(x)

    # layer1 / res2 (3 bottlenecks)
    for blk in params["layer1"]:
        if "wd" in blk:
            identity = conv1x1_bn(x, blk["wd"], blk["sd"], blk["bd"], relu=False)
        else:
            identity = x
        out = conv1x1_bn(x, blk["w1"], blk["s1"], blk["b1"], relu=True)
        out = conv3x3_bn_relu(out, blk["w2"], blk["s2"], blk["b2"])
        # fused: 1x1 conv + BN + residual add + ReLU in one kernel
        x = conv1x1_bn(out, blk["w3"], blk["s3"], blk["b3"], relu=True,
                       residual=identity)

    x = jnp.transpose(x.astype(jnp.float32), (0, 3, 1, 2))    # NHWC -> NCHW
    return x.reshape(B, T, x.shape[1], x.shape[2], x.shape[3])


# TODO(synk): pretrained torchvision weights are not loadable here; synthetic
# deterministic weights are used instead (same shapes / same math).

if __name__ == "__main__":
    key = jax.random.PRNGKey(0)
    pkey, xkey = jax.random.split(key)
    params = init_params(pkey)

    # small but representative: B=2 clips, T=2 frames, 3x32x32 images
    front_image = jax.random.normal(xkey, (2, 2, 3, 32, 32), jnp.float32)

    out = two_res_spatial_res2_forward(front_image, params)
    out = jax.block_until_ready(out)
    assert out.shape == (2, 2, 256, 8, 8), out.shape
    assert jnp.all(jnp.isfinite(out))
    print("KERNEL_OK")
</pallas_src>

<mosaic_0001>
module attributes {stable_mosaic.version = 11 : i64} {
  func.func @_mm_bias_kernel(%arg0: i32, %arg1: memref<512x147xbf16, #tpu.memory_space<vmem>>, %arg2: memref<147x64xbf16, #tpu.memory_space<vmem>>, %arg3: memref<1x64xf32, #tpu.memory_space<vmem>>, %arg4: memref<512x64xbf16, #tpu.memory_space<vmem>>) attributes {dimension_semantics = [#tpu.dimension_semantics<parallel>], iteration_bounds = array<i64: 2>, scalar_prefetch = 0 : i64, scratch_operands = 0 : i64, tpu.core_type = #tpu.core_type<tc>, window_params = [{transform_indices = @transform_0, window_bounds = array<i64: 512, 147>}, {pipeline_mode = #tpu.pipeline_mode<synchronous>, transform_indices = @transform_1, window_bounds = array<i64: 147, 64>}, {pipeline_mode = #tpu.pipeline_mode<synchronous>, transform_indices = @transform_2, window_bounds = array<i64: 1, 64>}, {transform_indices = @transform_3, window_bounds = array<i64: 512, 64>}]} {
    %c0 = arith.constant 0 : index
    %c0_0 = arith.constant 0 : index
    %0 = vector.load %arg1[%c0, %c0_0] : memref<512x147xbf16, #tpu.memory_space<vmem>>, vector<512x147xbf16>
    %c0_1 = arith.constant 0 : index
    %c0_2 = arith.constant 0 : index
    %1 = vector.load %arg2[%c0_1, %c0_2] : memref<147x64xbf16, #tpu.memory_space<vmem>>, vector<147x64xbf16>
    %cst = arith.constant dense<0.000000e+00> : vector<512x64xf32>
    %2 = tpu.matmul %0, %1, %cst {dimension_numbers = #tpu.dot_dimension_numbers<[1], [0], [0], [1], [0, 0, 1, 1], [], []>} : vector<512x147xbf16>, vector<147x64xbf16>, vector<512x64xf32> -> vector<512x64xf32>
    %c0_3 = arith.constant 0 : index
    %c0_4 = arith.constant 0 : index
    %3 = vector.load %arg3[%c0_3, %c0_4] : memref<1x64xf32, #tpu.memory_space<vmem>>, vector<1x64xf32>
    %4 = vector.broadcast %3 : vector<1x64xf32> to vector<512x64xf32>
    %5 = arith.addf %2, %4 : vector<512x64xf32>
    %cst_5 = arith.constant 0.000000e+00 : f32
    %6 = vector.broadcast %cst_5 : f32 to vector<512x64xf32>
    %7 = arith.maximumf %5, %6 : vector<512x64xf32>
    %8 = arith.truncf %7 : vector<512x64xf32> to vector<512x64xbf16>
    %c0_6 = arith.constant 0 : index
    %c0_7 = arith.constant 0 : index
    %9 = vector.load %arg4[%c0_6, %c0_7] : memref<512x64xbf16, #tpu.memory_space<vmem>>, vector<512x64xbf16>
    tpu.vector_store %arg4[%c0_6, %c0_7], %8 {strides = array<i32>} : memref<512x64xbf16, #tpu.memory_space<vmem>>, vector<512x64xbf16>,
    return
  }
  func.func @transform_0(%arg0: i32) -> (i32, i32) {
    %c0_i32 = arith.constant 0 : i32
    %c0_i32_0 = arith.constant 0 : i32
    return %arg0, %c0_i32 : i32, i32
  }
  func.func @transform_1(%arg0: i32) -> (i32, i32) {
    %c0_i32 = arith.constant 0 : i32
    %c0_i32_0 = arith.constant 0 : i32
    %c0_i32_1 = arith.constant 0 : i32
    return %c0_i32, %c0_i32_0 : i32, i32
  }
  func.func @transform_2(%arg0: i32) -> (i32, i32) {
    %c0_i32 = arith.constant 0 : i32
    %c0_i32_0 = arith.constant 0 : i32
    %c0_i32_1 = arith.constant 0 : i32
    return %c0_i32, %c0_i32_0 : i32, i32
  }
  func.func @transform_3(%arg0: i32) -> (i32, i32) {
    %c0_i32 = arith.constant 0 : i32
    %c0_i32_0 = arith.constant 0 : i32
    return %arg0, %c0_i32 : i32, i32
  }
}

</mosaic_0001>

<bundles_post_ra>
// kernel: tpu_custom_call.1
= control target key start
LH: loop header
LB: loop body
LE: loop exit
PB: predicated region body
PF: predicated region fallthrough
CT: control target
= control target key end

     0   :  { %s1861_s12 = smov 0   ;;  %s2209_s0 = inlined_call_operand.vmem [shape: bf16[1024,147], index: 0, kind: input, shape index: {}]   ;;  %s2210_s1 = inlined_call_operand.vmem [shape: bf16[147,64], index: 1, kind: input, shape index: {}]   ;;  %s2211_s2 = inlined_call_operand.vmem [shape: f32[1,64], index: 2, kind: input, shape index: {}]   ;;  %s2212_s3 = inlined_call_operand.vmem [shape: bf16[1024,64], index: 3, kind: output, shape index: {}]  }
   0x1 LB: > { %s1447_s13 = sadd.s32 4294967295, %s1837_s12   ;;  %p1451_p0 = scmp.ge.s32.totalorder %s1837_s12, 1  ;;  %s1837_s12 = sphi %s1861_s12, %s13_s12  }
   0x2   : > { %p139_p1 = scmp.lt.s32.totalorder %s1837_s12, 3 }
   0x4   : > { %p140_p2 = pnand %p1451_p0, %p139_p1 }
   0x5   : > { %v1725_v0 = vld [vmem:[%s2210_s1] sm:$0xff] (!%p140_p2)   ;;  %v1839_v1 = vmov (!%p140_p2), 0   ;;  %v1726_v2 = vld [vmem:[%s2210_s1 + $0x8] sm:$0xff] (!%p140_p2)   ;;  %v1727_v3 = vld [vmem:[%s2210_s1 + $0x10] sm:$0xff] (!%p140_p2)   ;;  %s1452_s20 = sshll.u32 (!%p140_p2), %s1447_s13, 6  ;;  %vm613_vm0 = vcmask (!%p140_p2), 154624  }
   0x6   : > { %143 = sbr.rel (%p140_p2) target bundleno = 387 (0x183), region = 32  ;;  %717 = vmatprep.subr.bf16.mxu0 (!%p140_p2), %v1839_v1  ;;  %1695 = vmatprep.subr.bf16.mxu1 (!%p140_p2), %v1839_v1  ;;  %p165_p3 = scmp.lt.s32.totalorder (!%p140_p2), %s1452_s20, 127  ;;  %v1728_v4 = vld [vmem:[%s2210_s1 + $0x18] sm:$0xff] (!%p140_p2)   ;;  %v1729_v5 = vld [vmem:[%s2210_s1 + $0x20] sm:$0xff] (!%p140_p2)   ;;  %v1730_v8 = vld [vmem:[%s2210_s1 + $0x28] sm:$0xff] (!%p140_p2)   ;;  %vm710_vm1 = vcmask (!%p140_p2), 1040384  }
   0x7   : > { %718 = vmatpush1.bf16.msra.mxu0 (!%p140_p2), %v1725_v0  ;;  %1705 = vmatpush1.bf16.msra.mxu1 (!%p140_p2), %v1725_v0  ;;  %v1731_v9 = vld [vmem:[%s2210_s1 + $0x30] sm:$0xff] (!%p140_p2)   ;;  %v1732_v10 = vld [vmem:[%s2210_s1 + $0x38] sm:$0xff] (!%p140_p2)   ;;  %vm711_vm2 = vcmask (!%p140_p2), 1041408   ;;  %v1840_v11 = vmov (!%p140_p2), 65535   ;;  %v1733_v13 = vld [vmem:[%s2210_s1 + $0x40] sm:$0xff] (!%p140_p2)   ;;  %vm1326_vm3 = vcmask (!%p140_p2), 519168  }
   0x8   : > { %719 = vmatprep.subr.bf16.mxu0 (!%p140_p2), %v1839_v1  ;;  %1696 = vmatprep.subr.bf16.mxu1 (!%p140_p2), %v1839_v1  ;;  %v712_v12 = vsel (!%p140_p2), %vm710_vm1, 4294967295, %v1840_v11  ;;  %v1734_v14 = vld [vmem:[%s2210_s1 + $0x48] ss:$0 sps:$4 sm:$0x33] (!%p140_p2)  }
   0x9   : > { %v713_v15 = vsel (!%p140_p2), %vm711_vm2, %v712_v12, 0 }
   0xa   : > { %v715_v16 = vand.u32 (!%p140_p2), %v1734_v14, %v713_v15  ;;  %v2006_v15 = vld [vmem:[%s2211_s2] ss:$0 sm:$0xff] (!%p140_p2) }
   0xb   : > { %720 = vmatpush1.bf16.msra.mxu0 (!%p140_p2), %v1726_v2  ;;  %1706 = vmatpush1.bf16.msra.mxu1 (!%p140_p2), %v1726_v2 }
   0xc   : > { %721 = vmatprep.subr.bf16.mxu0 (!%p140_p2), %v1839_v1  ;;  %1697 = vmatprep.subr.bf16.mxu1 (!%p140_p2), %v1839_v1 }
   0xd   : > { %s2214_s20 = smov (!%p165_p3, %s1452_s20), 127 }
   0xe   : > { %s1630_s23 = sshll.u32 %s2214_s20, 3  ;;  %s1456_s15 = sshll.u32 %s2214_s20, 2 }
   0xf   : > { %722 = vmatpush1.bf16.msra.mxu0 %v1727_v3  ;;  %1707 = vmatpush1.bf16.msra.mxu1 %v1727_v3  ;;  %s1887_s26 = scalar_lea.vmem %s2209_s0, %s1630_s23  ;;  %s2016_s18 = scalar_lea.vmem %s2212_s3, %s1456_s15 }
  0x10   : > { %723 = vmatprep.subr.bf16.mxu0 %v1839_v1  ;;  %1698 = vmatprep.subr.bf16.mxu1 %v1839_v1  ;;  %v1737_v6 = vld [vmem:[%s1887_s26 + $0x4] ss:$8 sps:$4 sm:$0xff]   ;;  %v1735_v17 = vld [vmem:[%s1887_s26] ss:$8 sps:$4 sm:$0xff]   ;;  %v1741_v19 = vld [vmem:[%s1887_s26 + $0x14] ss:$8 sps:$4 sm:$0xff]  }
  0x11   : > { %v1740_v7 = vld [vmem:[%s1887_s26 + $0x104] ss:$8 sps:$4 sm:$0xff]   ;;  %1532 = vmatprep.mubr.msk.bf16.mxu0 %vm613_vm0, %v1737_v6  ;;  %v1738_v18 = vld [vmem:[%s1887_s26 + $0x100] ss:$8 sps:$4 sm:$0xff]   ;;  %v1743_v20 = vld [vmem:[%s1887_s26 + $0x114] ss:$8 sps:$4 sm:$0xff]  }
  0x12   : > { %1548 = vmatprep.mubr.msk.bf16.mxu1 %vm613_vm0, %v1740_v7  ;;  %v1745_v21 = vld [vmem:[%s1887_s26 + $0x10] ss:$8 sps:$4 sm:$0xff]   ;;  %v1747_v23 = vld [vmem:[%s1887_s26 + $0x24] ss:$8 sps:$4 sm:$0xff]   ;;  %v1751_v25 = vld [vmem:[%s1887_s26 + $0x20] ss:$8 sps:$4 sm:$0xff]  }
  0x13   : > { %724 = vmatpush1.bf16.msra.mxu0 %v1728_v4  ;;  %1708 = vmatpush1.bf16.msra.mxu1 %v1728_v4  ;;  %v1746_v22 = vld [vmem:[%s1887_s26 + $0x110] ss:$8 sps:$4 sm:$0xff]   ;;  %v1749_v24 = vld [vmem:[%s1887_s26 + $0x124] ss:$8 sps:$4 sm:$0xff]   ;;  %v1752_v26 = vld [vmem:[%s1887_s26 + $0x120] ss:$8 sps:$4 sm:$0xff]  }
  0x14   : > { %725 = vmatprep.subr.bf16.mxu0 %v1839_v1  ;;  %1699 = vmatprep.subr.bf16.mxu1 %v1839_v1  ;;  %v1753_v27 = vld [vmem:[%s1887_s26 + $0x34] ss:$8 sps:$4 sm:$0xff]   ;;  %v1757_v29 = vld [vmem:[%s1887_s26 + $0x30] ss:$8 sps:$4 sm:$0xff]   ;;  %v1759_v31 = vld [vmem:[%s1887_s26 + $0x44] ss:$8 sps:$4 sm:$0xff]  }
  0x15   : > { %v1755_v28 = vld [vmem:[%s1887_s26 + $0x134] ss:$8 sps:$4 sm:$0xff]   ;;  %v1758_v30 = vld [vmem:[%s1887_s26 + $0x130] ss:$8 sps:$4 sm:$0xff]   ;;  %v1761_v32 = vld [vmem:[%s1887_s26 + $0x144] ss:$8 sps:$4 sm:$0xff]  }
  0x16   : > { %v1763_v33 = vld [vmem:[%s1887_s26 + $0x40] ss:$8 sps:$4 sm:$0xff]   ;;  %v1765_v35 = vld [vmem:[%s1887_s26 + $0x54] ss:$8 sps:$4 sm:$0xff]   ;;  %v1769_v37 = vld [vmem:[%s1887_s26 + $0x50] ss:$8 sps:$4 sm:$0xff]  }
  0x17   : > { %726 = vmatpush1.bf16.msra.mxu0 %v1729_v5  ;;  %1709 = vmatpush1.bf16.msra.mxu1 %v1729_v5  ;;  %v1764_v34 = vld [vmem:[%s1887_s26 + $0x140] ss:$8 sps:$4 sm:$0xff]   ;;  %v1767_v36 = vld [vmem:[%s1887_s26 + $0x154] ss:$8 sps:$4 sm:$0xff]   ;;  %v1770_v38 = vld [vmem:[%s1887_s26 + $0x150] ss:$8 sps:$4 sm:$0xff]  }
  0x18   : > { %727 = vmatprep.subr.bf16.mxu0 %v1839_v1  ;;  %1700 = vmatprep.subr.bf16.mxu1 %v1839_v1  ;;  %v1771_v39 = vld [vmem:[%s1887_s26 + $0x64] ss:$8 sps:$4 sm:$0xff]   ;;  %v1775_v41 = vld [vmem:[%s1887_s26 + $0x60] ss:$8 sps:$4 sm:$0xff]   ;;  %v1777_v43 = vld [vmem:[%s1887_s26 + $0x74] ss:$8 sps:$4 sm:$0xff]  }
  0x19   : > { %v1773_v40 = vld [vmem:[%s1887_s26 + $0x164] ss:$8 sps:$4 sm:$0xff]   ;;  %v1776_v42 = vld [vmem:[%s1887_s26 + $0x160] ss:$8 sps:$4 sm:$0xff]   ;;  %v1779_v44 = vld [vmem:[%s1887_s26 + $0x174] ss:$8 sps:$4 sm:$0xff]  }
  0x1a   : > { %v1781_v45 = vld [vmem:[%s1887_s26 + $0x70] ss:$8 sps:$4 sm:$0xff]   ;;  %v1783_v47 = vld [vmem:[%s1887_s26 + $0x84] ss:$8 sps:$4 sm:$0xff]   ;;  %v1787_v49 = vld [vmem:[%s1887_s26 + $0x80] ss:$8 sps:$4 sm:$0xff]  }
  0x1b   : > { %728 = vmatpush1.bf16.msra.mxu0 %v1730_v8  ;;  %1710 = vmatpush1.bf16.msra.mxu1 %v1730_v8  ;;  %v1782_v46 = vld [vmem:[%s1887_s26 + $0x170] ss:$8 sps:$4 sm:$0xff]   ;;  %v1785_v48 = vld [vmem:[%s1887_s26 + $0x184] ss:$8 sps:$4 sm:$0xff]   ;;  %v1788_v50 = vld [vmem:[%s1887_s26 + $0x180] ss:$8 sps:$4 sm:$0xff]  }
  0x1c   : > { %729 = vmatprep.subr.bf16.mxu0 %v1839_v1  ;;  %1701 = vmatprep.subr.bf16.mxu1 %v1839_v1  ;;  %v1789_v51 = vld [vmem:[%s1887_s26 + $0x94] ss:$8 sps:$4 sm:$0xff]   ;;  %v1793_v53 = vld [vmem:[%s1887_s26 + $0x90] ss:$8 sps:$4 sm:$0xff]   ;;  %v1795_v55 = vld [vmem:[%s1887_s26 + $0xa4] ss:$8 sps:$4 sm:$0xff]  }
  0x1d   : > { %v1791_v52 = vld [vmem:[%s1887_s26 + $0x194] ss:$8 sps:$4 sm:$0xff]   ;;  %v1794_v54 = vld [vmem:[%s1887_s26 + $0x190] ss:$8 sps:$4 sm:$0xff]   ;;  %v1797_v56 = vld [vmem:[%s1887_s26 + $0x1a4] ss:$8 sps:$4 sm:$0xff]  }
  0x1e   : > { %v1799_v57 = vld [vmem:[%s1887_s26 + $0xa0] ss:$8 sps:$4 sm:$0xff]   ;;  %v1801_v59 = vld [vmem:[%s1887_s26 + $0xb4] ss:$8 sps:$4 sm:$0xff]   ;;  %v1805_v61 = vld [vmem:[%s1887_s26 + $0xb0] ss:$8 sps:$4 sm:$0xff]  }
  0x1f   : > { %730 = vmatpush1.bf16.msra.mxu0 %v1731_v9  ;;  %1711 = vmatpush1.bf16.msra.mxu1 %v1731_v9  ;;  %v1800_v58 = vld [vmem:[%s1887_s26 + $0x1a0] ss:$8 sps:$4 sm:$0xff]   ;;  %v1803_v60 = vld [vmem:[%s1887_s26 + $0x1b4] ss:$8 sps:$4 sm:$0xff]   ;;  %v1806_v62 = vld [vmem:[%s1887_s26 + $0x1b0] ss:$8 sps:$4 sm:$0xff]  }
  0x20   : > { %731 = vmatprep.subr.bf16.mxu0 %v1839_v1  ;;  %1702 = vmatprep.subr.bf16.mxu1 %v1839_v1  ;;  %v1807_v63 = vld [vmem:[%s1887_s26 + $0xc4] ss:$8 sps:$4 sm:$0xff]   ;;  %v1812_v2 = vld [vmem:[%s1887_s26 + $0x1c0] ss:$8 sps:$4 sm:$0xff]   ;;  %v1813_v3 = vld [vmem:[%s1887_s26 + $0xd4] ss:$8 sps:$4 sm:$0xff]  }
  0x21   : > { %v1809_v0 = vld [vmem:[%s1887_s26 + $0x1c4] ss:$8 sps:$4 sm:$0xff]   ;;  %v1815_v4 = vld [vmem:[%s1887_s26 + $0x1d4] ss:$8 sps:$4 sm:$0xff]   ;;  %v1817_v5 = vld [vmem:[%s1887_s26 + $0xd0] ss:$8 sps:$4 sm:$0xff]  }
  0x22   : > { %v1818_v6 = vld [vmem:[%s1887_s26 + $0x1d0] ss:$8 sps:$4 sm:$0xff]   ;;  %v1819_v7 = vld [vmem:[%s1887_s26 + $0xe4] ss:$8 sps:$4 sm:$0xff]   ;;  %v1823_v9 = vld [vmem:[%s1887_s26 + $0xe0] ss:$8 sps:$4 sm:$0xff]  }
  0x23   : > { %732 = vmatpush1.bf16.msra.mxu0 %v1732_v10  ;;  %1712 = vmatpush1.bf16.msra.mxu1 %v1732_v10  ;;  %v1821_v8 = vld [vmem:[%s1887_s26 + $0x1e4] ss:$8 sps:$4 sm:$0xff]   ;;  %v1824_v10 = vld [vmem:[%s1887_s26 + $0x1e0] ss:$8 sps:$4 sm:$0xff]   ;;  %v1825_v11 = vld [vmem:[%s1887_s26 + $0xf4] ss:$8 sps:$4 sm:$0xff]  }
  0x24   : > { %733 = vmatprep.subr.bf16.mxu0 %v1839_v1  ;;  %1703 = vmatprep.subr.bf16.mxu1 %v1839_v1  ;;  %v1827_v12 = vld [vmem:[%s1887_s26 + $0x1f4] ss:$8 sps:$4 sm:$0xff]   ;;  %v1830_v14 = vld [vmem:[%s1887_s26 + $0x1f0] ss:$8 sps:$4 sm:$0xff]  }
  0x27   : > { %734 = vmatpush1.bf16.msra.mxu0 %v1733_v13  ;;  %1713 = vmatpush1.bf16.msra.mxu1 %v1733_v13  ;;  %v1829_v13 = vld [vmem:[%s1887_s26 + $0xf0] ss:$8 sps:$4 sm:$0xff]  }
  0x28   : > { %735 = vmatprep.subr.bf16.mxu0 %v1839_v1  ;;  %1704 = vmatprep.subr.bf16.mxu1 %v1839_v1  ;;  %v1811_v1 = vld [vmem:[%s1887_s26 + $0xc0] ss:$8 sps:$4 sm:$0xff]  }
  0x2b   : > { %736 = vmatpush1.bf16.msra.mxu0 %v715_v16  ;;  %1714 = vmatpush1.bf16.msra.mxu1 %v715_v16 }
  0x2e   : > { %750 = vmatmul.mubr.bf16.vlgmr.msra.gmra.mrb[0].mxu0 %v1735_v17  ;;  %878 = vmatmul.mubr.bf16.vlgmr.msra.gmra.mrb[0].mxu1 %v1738_v18 }
  0x2f   : > { %1533 = vmatprep.mubr.msk.bf16.mxu0 %vm613_vm0, %v1741_v19  ;;  %1549 = vmatprep.mubr.msk.bf16.mxu1 %vm613_vm0, %v1743_v20 }
  0x36   : > { %758 = vmatmul.mubr.bf16.gmra.mrb[4].mxu0 %v1745_v21  ;;  %886 = vmatmul.mubr.bf16.gmra.mrb[4].mxu1 %v1746_v22 }
  0x37   : > { %1534 = vmatprep.mubr.msk.bf16.mxu0 %vm613_vm0, %v1747_v23  ;;  %1550 = vmatprep.mubr.msk.bf16.mxu1 %vm613_vm0, %v1749_v24 }
  0x3e   : > { %766 = vmatmul.mubr.bf16.gmra.mrb[8].mxu0 %v1751_v25  ;;  %894 = vmatmul.mubr.bf16.gmra.mrb[8].mxu1 %v1752_v26 }
  0x3f   : > { %1535 = vmatprep.mubr.msk.bf16.mxu0 %vm613_vm0, %v1753_v27  ;;  %1551 = vmatprep.mubr.msk.bf16.mxu1 %vm613_vm0, %v1755_v28 }
  0x46   : > { %774 = vmatmul.mubr.bf16.gmra.mrb[12].mxu0 %v1757_v29  ;;  %902 = vmatmul.mubr.bf16.gmra.mrb[12].mxu1 %v1758_v30 }
  0x47   : > { %1536 = vmatprep.mubr.msk.bf16.mxu0 %vm613_vm0, %v1759_v31  ;;  %1552 = vmatprep.mubr.msk.bf16.mxu1 %vm613_vm0, %v1761_v32 }
  0x4e   : > { %782 = vmatmul.mubr.bf16.gmra.mrb[16].mxu0 %v1763_v33  ;;  %910 = vmatmul.mubr.bf16.gmra.mrb[16].mxu1 %v1764_v34 }
  0x4f   : > { %1537 = vmatprep.mubr.msk.bf16.mxu0 %vm613_vm0, %v1765_v35  ;;  %1553 = vmatprep.mubr.msk.bf16.mxu1 %vm613_vm0, %v1767_v36 }
  0x56   : > { %790 = vmatmul.mubr.bf16.gmra.mrb[20].mxu0 %v1769_v37  ;;  %918 = vmatmul.mubr.bf16.gmra.mrb[20].mxu1 %v1770_v38 }
  0x57   : > { %1538 = vmatprep.mubr.msk.bf16.mxu0 %vm613_vm0, %v1771_v39  ;;  %1554 = vmatprep.mubr.msk.bf16.mxu1 %vm613_vm0, %v1773_v40 }
  0x5e   : > { %798 = vmatmul.mubr.bf16.gmra.mrb[24].mxu0 %v1775_v41  ;;  %926 = vmatmul.mubr.bf16.gmra.mrb[24].mxu1 %v1776_v42 }
  0x5f   : > { %1539 = vmatprep.mubr.msk.bf16.mxu0 %vm613_vm0, %v1777_v43  ;;  %1555 = vmatprep.mubr.msk.bf16.mxu1 %vm613_vm0, %v1779_v44 }
  0x66   : > { %806 = vmatmul.mubr.bf16.gmra.mrb[28].mxu0 %v1781_v45  ;;  %934 = vmatmul.mubr.bf16.gmra.mrb[28].mxu1 %v1782_v46 }
  0x67   : > { %1540 = vmatprep.mubr.msk.bf16.mxu0 %vm613_vm0, %v1783_v47  ;;  %1556 = vmatprep.mubr.msk.bf16.mxu1 %vm613_vm0, %v1785_v48 }
  0x6e   : > { %814 = vmatmul.mubr.bf16.gmra.mrb[32].mxu0 %v1787_v49  ;;  %942 = vmatmul.mubr.bf16.gmra.mrb[32].mxu1 %v1788_v50 }
  0x6f   : > { %1541 = vmatprep.mubr.msk.bf16.mxu0 %vm613_vm0, %v1789_v51  ;;  %1557 = vmatprep.mubr.msk.bf16.mxu1 %vm613_vm0, %v1791_v52 }
  0x76   : > { %822 = vmatmul.mubr.bf16.gmra.mrb[36].mxu0 %v1793_v53  ;;  %950 = vmatmul.mubr.bf16.gmra.mrb[36].mxu1 %v1794_v54 }
  0x77   : > { %1542 = vmatprep.mubr.msk.bf16.mxu0 %vm613_vm0, %v1795_v55  ;;  %1558 = vmatprep.mubr.msk.bf16.mxu1 %vm613_vm0, %v1797_v56 }
  0x7e   : > { %830 = vmatmul.mubr.bf16.gmra.mrb[40].mxu0 %v1799_v57  ;;  %958 = vmatmul.mubr.bf16.gmra.mrb[40].mxu1 %v1800_v58 }
  0x7f   : > { %1543 = vmatprep.mubr.msk.bf16.mxu0 %vm613_vm0, %v1801_v59  ;;  %1559 = vmatprep.mubr.msk.bf16.mxu1 %vm613_vm0, %v1803_v60 }
  0x86   : > { %838 = vmatmul.mubr.bf16.gmra.mrb[44].mxu0 %v1805_v61  ;;  %966 = vmatmul.mubr.bf16.gmra.mrb[44].mxu1 %v1806_v62 }
  0x87   : > { %1544 = vmatprep.mubr.msk.bf16.mxu0 %vm613_vm0, %v1807_v63  ;;  %1560 = vmatprep.mubr.msk.bf16.mxu1 %vm613_vm0, %v1809_v0 }
  0x8e   : > { %846 = vmatmul.mubr.bf16.gmra.mrb[48].mxu0 %v1811_v1  ;;  %974 = vmatmul.mubr.bf16.gmra.mrb[48].mxu1 %v1812_v2 }
  0x8f   : > { %1545 = vmatprep.mubr.msk.bf16.mxu0 %vm613_vm0, %v1813_v3  ;;  %1561 = vmatprep.mubr.msk.bf16.mxu1 %vm613_vm0, %v1815_v4 }
  0x96   : > { %854 = vmatmul.mubr.bf16.gmra.mrb[52].mxu0 %v1817_v5  ;;  %982 = vmatmul.mubr.bf16.gmra.mrb[52].mxu1 %v1818_v6 }
  0x97   : > { %1546 = vmatprep.mubr.msk.bf16.mxu0 %vm613_vm0, %v1819_v7  ;;  %1562 = vmatprep.mubr.msk.bf16.mxu1 %vm613_vm0, %v1821_v8 }
  0x9e   : > { %862 = vmatmul.mubr.bf16.gmra.mrb[56].mxu0 %v1823_v9  ;;  %990 = vmatmul.mubr.bf16.gmra.mrb[56].mxu1 %v1824_v10 }
  0x9f   : > { %1547 = vmatprep.mubr.msk.bf16.mxu0 %vm613_vm0, %v1825_v11  ;;  %1563 = vmatprep.mubr.msk.bf16.mxu1 %vm613_vm0, %v1827_v12 }
  0xa6   : > { %870 = vmatmul.mubr.bf16.gmra.mrb[60].mxu0 %v1829_v13  ;;  %998 = vmatmul.mubr.bf16.gmra.mrb[60].mxu1 %v1830_v14 }
 0x101   : > { %v751_v16 = vpop.f32.mrb[0].mxu0  ;;  %v879_v17 = vpop.f32.mrb[0].mxu1 }
 0x102   : > { %v752_v18 = vadd.f32 %v2006_v15, %v751_v16  ;;  %v880_v19 = vadd.f32 %v2006_v15, %v879_v17  ;;  %v753_v20 = vpop.f32.mrb[1].mxu0  ;;  %v881_v21 = vpop.f32.mrb[1].mxu1 }
 0x103   : > { %v754_v22 = vpop.f32.mrb[2].mxu0  ;;  %v882_v23 = vpop.f32.mrb[2].mxu1 }
 0x104   : > { %v1006_v24 = vmax.f32 %v752_v18, 0.0  ;;  %v1038_v25 = vmax.f32 %v880_v19, 0.0  ;;  %v755_v26 = vadd.f32 %v2006_v15, %v754_v22  ;;  %v883_v27 = vadd.f32 %v2006_v15, %v882_v23  ;;  %v756_v28 = vpop.f32.mrb[3].mxu0  ;;  %v884_v29 = vpop.f32.mrb[3].mxu1 }
 0x106   : > { %v1631_v30 = vpack.c.bf16 %v1006_v24, %v1006_v24  ;;  %v1663_v31 = vpack.c.bf16 %v1038_v25, %v1038_v25  ;;  %v1007_v32 = vmax.f32 %v755_v26, 0.0  ;;  %v1039_v33 = vmax.f32 %v883_v27, 0.0 }
 0x108   : > { %1327 = vst.msk [vmem:[%s2016_s18] sm:$0xf] %vm1326_vm3, %v1631_v30  ;;  %1359 = vst.msk [vmem:[%s2016_s18 + $0x80] sm:$0xf] %vm1326_vm3, %v1663_v31  ;;  %v1632_v34 = vpack.c.bf16 %v1007_v32, %v1007_v32  ;;  %v1664_v35 = vpack.c.bf16 %v1039_v33, %v1039_v33 }
 0x109   : > { %v759_v36 = vpop.f32.mrb[4].mxu0  ;;  %v887_v37 = vpop.f32.mrb[4].mxu1 }
 0x10a   : > { %1328 = vst.msk [vmem:[%s2016_s18 + $0x4] sm:$0xf] %vm1326_vm3, %v1632_v34  ;;  %1360 = vst.msk [vmem:[%s2016_s18 + $0x84] sm:$0xf] %vm1326_vm3, %v1664_v35  ;;  %v760_v38 = vadd.f32 %v2006_v15, %v759_v36  ;;  %v888_v39 = vadd.f32 %v2006_v15, %v887_v37  ;;  %v761_v40 = vpop.f32.mrb[5].mxu0  ;;  %v889_v41 = vpop.f32.mrb[5].mxu1 }
 0x10b   : > { %v762_v42 = vpop.f32.mrb[6].mxu0  ;;  %v890_v43 = vpop.f32.mrb[6].mxu1 }
 0x10c   : > { %v1008_v44 = vmax.f32 %v760_v38, 0.0  ;;  %v1040_v45 = vmax.f32 %v888_v39, 0.0  ;;  %v763_v46 = vadd.f32 %v2006_v15, %v762_v42  ;;  %v891_v47 = vadd.f32 %v2006_v15, %v890_v43  ;;  %v764_v48 = vpop.f32.mrb[7].mxu0  ;;  %v892_v49 = vpop.f32.mrb[7].mxu1 }
 0x10e   : > { %v1633_v50 = vpack.c.bf16 %v1008_v44, %v1008_v44  ;;  %v1665_v51 = vpack.c.bf16 %v1040_v45, %v1040_v45  ;;  %v1009_v52 = vmax.f32 %v763_v46, 0.0  ;;  %v1041_v53 = vmax.f32 %v891_v47, 0.0 }
 0x110   : > { %1329 = vst.msk [vmem:[%s2016_s18 + $0x8] sm:$0xf] %vm1326_vm3, %v1633_v50  ;;  %1361 = vst.msk [vmem:[%s2016_s18 + $0x88] sm:$0xf] %vm1326_vm3, %v1665_v51  ;;  %v1634_v54 = vpack.c.bf16 %v1009_v52, %v1009_v52  ;;  %v1666_v55 = vpack.c.bf16 %v1041_v53, %v1041_v53 }
 0x111   : > { %v767_v56 = vpop.f32.mrb[8].mxu0  ;;  %v895_v57 = vpop.f32.mrb[8].mxu1 }
 0x112   : > { %1330 = vst.msk [vmem:[%s2016_s18 + $0xc] sm:$0xf] %vm1326_vm3, %v1634_v54  ;;  %1362 = vst.msk [vmem:[%s2016_s18 + $0x8c] sm:$0xf] %vm1326_vm3, %v1666_v55  ;;  %v768_v58 = vadd.f32 %v2006_v15, %v767_v56  ;;  %v896_v59 = vadd.f32 %v2006_v15, %v895_v57  ;;  %v769_v60 = vpop.f32.mrb[9].mxu0  ;;  %v897_v61 = vpop.f32.mrb[9].mxu1 }
 0x113   : > { %v770_v62 = vpop.f32.mrb[10].mxu0  ;;  %v898_v63 = vpop.f32.mrb[10].mxu1 }
 0x114   : > { %v1010_v0 = vmax.f32 %v768_v58, 0.0  ;;  %v1042_v1 = vmax.f32 %v896_v59, 0.0  ;;  %v771_v2 = vadd.f32 %v2006_v15, %v770_v62  ;;  %v899_v3 = vadd.f32 %v2006_v15, %v898_v63  ;;  %v772_v4 = vpop.f32.mrb[11].mxu0  ;;  %v900_v5 = vpop.f32.mrb[11].mxu1 }
 0x116   : > { %v1635_v6 = vpack.c.bf16 %v1010_v0, %v1010_v0  ;;  %v1667_v7 = vpack.c.bf16 %v1042_v1, %v1042_v1  ;;  %v1011_v8 = vmax.f32 %v771_v2, 0.0  ;;  %v1043_v9 = vmax.f32 %v899_v3, 0.0 }
 0x118   : > { %1331 = vst.msk [vmem:[%s2016_s18 + $0x10] sm:$0xf] %vm1326_vm3, %v1635_v6  ;;  %1363 = vst.msk [vmem:[%s2016_s18 + $0x90] sm:$0xf] %vm1326_vm3, %v1667_v7  ;;  %v1636_v10 = vpack.c.bf16 %v1011_v8, %v1011_v8  ;;  %v1668_v11 = vpack.c.bf16 %v1043_v9, %v1043_v9 }
 0x119   : > { %v775_v12 = vpop.f32.mrb[12].mxu0  ;;  %v903_v13 = vpop.f32.mrb[12].mxu1 }
 0x11a   : > { %1332 = vst.msk [vmem:[%s2016_s18 + $0x14] sm:$0xf] %vm1326_vm3, %v1636_v10  ;;  %1364 = vst.msk [vmem:[%s2016_s18 + $0x94] sm:$0xf] %vm1326_vm3, %v1668_v11  ;;  %v776_v14 = vadd.f32 %v2006_v15, %v775_v12  ;;  %v904_v16 = vadd.f32 %v2006_v15, %v903_v13  ;;  %v777_v17 = vpop.f32.mrb[13].mxu0  ;;  %v905_v18 = vpop.f32.mrb[13].mxu1 }
 0x11b   : > { %v778_v19 = vpop.f32.mrb[14].mxu0  ;;  %v906_v20 = vpop.f32.mrb[14].mxu1 }
 0x11c   : > { %v1012_v21 = vmax.f32 %v776_v14, 0.0  ;;  %v1044_v22 = vmax.f32 %v904_v16, 0.0  ;;  %v779_v23 = vadd.f32 %v2006_v15, %v778_v19  ;;  %v907_v24 = vadd.f32 %v2006_v15, %v906_v20  ;;  %v780_v25 = vpop.f32.mrb[15].mxu0  ;;  %v908_v26 = vpop.f32.mrb[15].mxu1 }
 0x11e   : > { %v1637_v27 = vpack.c.bf16 %v1012_v21, %v1012_v21  ;;  %v1669_v28 = vpack.c.bf16 %v1044_v22, %v1044_v22  ;;  %v1013_v29 = vmax.f32 %v779_v23, 0.0  ;;  %v1045_v30 = vmax.f32 %v907_v24, 0.0 }
 0x120   : > { %1333 = vst.msk [vmem:[%s2016_s18 + $0x18] sm:$0xf] %vm1326_vm3, %v1637_v27  ;;  %1365 = vst.msk [vmem:[%s2016_s18 + $0x98] sm:$0xf] %vm1326_vm3, %v1669_v28  ;;  %v1638_v31 = vpack.c.bf16 %v1013_v29, %v1013_v29  ;;  %v1670_v32 = vpack.c.bf16 %v1045_v30, %v1045_v30 }
 0x121   : > { %v783_v33 = vpop.f32.mrb[16].mxu0  ;;  %v911_v34 = vpop.f32.mrb[16].mxu1 }
 0x122   : > { %1334 = vst.msk [vmem:[%s2016_s18 + $0x1c] sm:$0xf] %vm1326_vm3, %v1638_v31  ;;  %1366 = vst.msk [vmem:[%s2016_s18 + $0x9c] sm:$0xf] %vm1326_vm3, %v1670_v32  ;;  %v784_v35 = vadd.f32 %v2006_v15, %v783_v33  ;;  %v912_v36 = vadd.f32 %v2006_v15, %v911_v34  ;;  %v785_v37 = vpop.f32.mrb[17].mxu0  ;;  %v913_v38 = vpop.f32.mrb[17].mxu1 }
 0x123   : > { %v786_v39 = vpop.f32.mrb[18].mxu0  ;;  %v914_v40 = vpop.f32.mrb[18].mxu1 }
 0x124   : > { %v1014_v41 = vmax.f32 %v784_v35, 0.0  ;;  %v1046_v42 = vmax.f32 %v912_v36, 0.0  ;;  %v787_v43 = vadd.f32 %v2006_v15, %v786_v39  ;;  %v915_v44 = vadd.f32 %v2006_v15, %v914_v40  ;;  %v788_v45 = vpop.f32.mrb[19].mxu0  ;;  %v916_v46 = vpop.f32.mrb[19].mxu1 }
 0x126   : > { %v1639_v47 = vpack.c.bf16 %v1014_v41, %v1014_v41  ;;  %v1671_v48 = vpack.c.bf16 %v1046_v42, %v1046_v42  ;;  %v1015_v49 = vmax.f32 %v787_v43, 0.0  ;;  %v1047_v50 = vmax.f32 %v915_v44, 0.0 }
 0x128   : > { %1335 = vst.msk [vmem:[%s2016_s18 + $0x20] sm:$0xf] %vm1326_vm3, %v1639_v47  ;;  %1367 = vst.msk [vmem:[%s2016_s18 + $0xa0] sm:$0xf] %vm1326_vm3, %v1671_v48  ;;  %v1640_v51 = vpack.c.bf16 %v1015_v49, %v1015_v49  ;;  %v1672_v52 = vpack.c.bf16 %v1047_v50, %v1047_v50 }
 0x129   : > { %v791_v53 = vpop.f32.mrb[20].mxu0  ;;  %v919_v54 = vpop.f32.mrb[20].mxu1 }
 0x12a   : > { %1336 = vst.msk [vmem:[%s2016_s18 + $0x24] sm:$0xf] %vm1326_vm3, %v1640_v51  ;;  %1368 = vst.msk [vmem:[%s2016_s18 + $0xa4] sm:$0xf] %vm1326_vm3, %v1672_v52  ;;  %v792_v55 = vadd.f32 %v2006_v15, %v791_v53  ;;  %v920_v56 = vadd.f32 %v2006_v15, %v919_v54  ;;  %v793_v57 = vpop.f32.mrb[21].mxu0  ;;  %v921_v58 = vpop.f32.mrb[21].mxu1 }
 0x12b   : > { %v794_v59 = vpop.f32.mrb[22].mxu0  ;;  %v922_v60 = vpop.f32.mrb[22].mxu1 }
 0x12c   : > { %v1016_v61 = vmax.f32 %v792_v55, 0.0  ;;  %v1048_v62 = vmax.f32 %v920_v56, 0.0  ;;  %v795_v63 = vadd.f32 %v2006_v15, %v794_v59  ;;  %v923_v0 = vadd.f32 %v2006_v15, %v922_v60  ;;  %v796_v1 = vpop.f32.mrb[23].mxu0  ;;  %v924_v2 = vpop.f32.mrb[23].mxu1 }
 0x12e   : > { %v1641_v3 = vpack.c.bf16 %v1016_v61, %v1016_v61  ;;  %v1673_v4 = vpack.c.bf16 %v1048_v62, %v1048_v62  ;;  %v1017_v5 = vmax.f32 %v795_v63, 0.0  ;;  %v1049_v6 = vmax.f32 %v923_v0, 0.0 }
 0x130   : > { %1337 = vst.msk [vmem:[%s2016_s18 + $0x28] sm:$0xf] %vm1326_vm3, %v1641_v3  ;;  %1369 = vst.msk [vmem:[%s2016_s18 + $0xa8] sm:$0xf] %vm1326_vm3, %v1673_v4  ;;  %v1642_v7 = vpack.c.bf16 %v1017_v5, %v1017_v5  ;;  %v1674_v8 = vpack.c.bf16 %v1049_v6, %v1049_v6 }
 0x131   : > { %v799_v9 = vpop.f32.mrb[24].mxu0  ;;  %v927_v10 = vpop.f32.mrb[24].mxu1 }
 0x132   : > { %1338 = vst.msk [vmem:[%s2016_s18 + $0x2c] sm:$0xf] %vm1326_vm3, %v1642_v7  ;;  %1370 = vst.msk [vmem:[%s2016_s18 + $0xac] sm:$0xf] %vm1326_vm3, %v1674_v8  ;;  %v800_v11 = vadd.f32 %v2006_v15, %v799_v9  ;;  %v928_v12 = vadd.f32 %v2006_v15, %v927_v10  ;;  %v801_v13 = vpop.f32.mrb[25].mxu0  ;;  %v929_v14 = vpop.f32.mrb[25].mxu1 }
 0x133   : > { %v802_v16 = vpop.f32.mrb[26].mxu0  ;;  %v930_v17 = vpop.f32.mrb[26].mxu1 }
 0x134   : > { %v1018_v18 = vmax.f32 %v800_v11, 0.0  ;;  %v1050_v19 = vmax.f32 %v928_v12, 0.0  ;;  %v803_v20 = vadd.f32 %v2006_v15, %v802_v16  ;;  %v931_v21 = vadd.f32 %v2006_v15, %v930_v17  ;;  %v804_v22 = vpop.f32.mrb[27].mxu0  ;;  %v932_v23 = vpop.f32.mrb[27].mxu1 }
 0x136   : > { %v1643_v24 = vpack.c.bf16 %v1018_v18, %v1018_v18  ;;  %v1675_v25 = vpack.c.bf16 %v1050_v19, %v1050_v19  ;;  %v1019_v26 = vmax.f32 %v803_v20, 0.0  ;;  %v1051_v27 = vmax.f32 %v931_v21, 0.0 }
 0x138   : > { %1339 = vst.msk [vmem:[%s2016_s18 + $0x30] sm:$0xf] %vm1326_vm3, %v1643_v24  ;;  %1371 = vst.msk [vmem:[%s2016_s18 + $0xb0] sm:$0xf] %vm1326_vm3, %v1675_v25  ;;  %v1644_v28 = vpack.c.bf16 %v1019_v26, %v1019_v26  ;;  %v1676_v29 = vpack.c.bf16 %v1051_v27, %v1051_v27 }
 0x139   : > { %v807_v30 = vpop.f32.mrb[28].mxu0  ;;  %v935_v31 = vpop.f32.mrb[28].mxu1 }
 0x13a   : > { %1340 = vst.msk [vmem:[%s2016_s18 + $0x34] sm:$0xf] %vm1326_vm3, %v1644_v28  ;;  %1372 = vst.msk [vmem:[%s2016_s18 + $0xb4] sm:$0xf] %vm1326_vm3, %v1676_v29  ;;  %v808_v32 = vadd.f32 %v2006_v15, %v807_v30  ;;  %v936_v33 = vadd.f32 %v2006_v15, %v935_v31  ;;  %v809_v34 = vpop.f32.mrb[29].mxu0  ;;  %v937_v35 = vpop.f32.mrb[29].mxu1 }
 0x13b   : > { %v810_v36 = vpop.f32.mrb[30].mxu0  ;;  %v938_v37 = vpop.f32.mrb[30].mxu1 }
 0x13c   : > { %v1020_v38 = vmax.f32 %v808_v32, 0.0  ;;  %v1052_v39 = vmax.f32 %v936_v33, 0.0  ;;  %v811_v40 = vadd.f32 %v2006_v15, %v810_v36  ;;  %v939_v41 = vadd.f32 %v2006_v15, %v938_v37  ;;  %v812_v42 = vpop.f32.mrb[31].mxu0  ;;  %v940_v43 = vpop.f32.mrb[31].mxu1 }
 0x13e   : > { %v1645_v44 = vpack.c.bf16 %v1020_v38, %v1020_v38  ;;  %v1677_v45 = vpack.c.bf16 %v1052_v39, %v1052_v39  ;;  %v1021_v46 = vmax.f32 %v811_v40, 0.0  ;;  %v1053_v47 = vmax.f32 %v939_v41, 0.0 }
 0x140   : > { %1341 = vst.msk [vmem:[%s2016_s18 + $0x38] sm:$0xf] %vm1326_vm3, %v1645_v44  ;;  %1373 = vst.msk [vmem:[%s2016_s18 + $0xb8] sm:$0xf] %vm1326_vm3, %v1677_v45  ;;  %v1646_v48 = vpack.c.bf16 %v1021_v46, %v1021_v46  ;;  %v1678_v49 = vpack.c.bf16 %v1053_v47, %v1053_v47 }
 0x141   : > { %v815_v50 = vpop.f32.mrb[32].mxu0  ;;  %v943_v51 = vpop.f32.mrb[32].mxu1 }
 0x142   : > { %1342 = vst.msk [vmem:[%s2016_s18 + $0x3c] sm:$0xf] %vm1326_vm3, %v1646_v48  ;;  %1374 = vst.msk [vmem:[%s2016_s18 + $0xbc] sm:$0xf] %vm1326_vm3, %v1678_v49  ;;  %v816_v52 = vadd.f32 %v2006_v15, %v815_v50  ;;  %v944_v53 = vadd.f32 %v2006_v15, %v943_v51  ;;  %v817_v54 = vpop.f32.mrb[33].mxu0  ;;  %v945_v55 = vpop.f32.mrb[33].mxu1 }
 0x143   : > { %v818_v56 = vpop.f32.mrb[34].mxu0  ;;  %v946_v57 = vpop.f32.mrb[34].mxu1 }
 0x144   : > { %v1022_v58 = vmax.f32 %v816_v52, 0.0  ;;  %v1054_v59 = vmax.f32 %v944_v53, 0.0  ;;  %v819_v60 = vadd.f32 %v2006_v15, %v818_v56  ;;  %v947_v61 = vadd.f32 %v2006_v15, %v946_v57  ;;  %v820_v62 = vpop.f32.mrb[35].mxu0  ;;  %v948_v63 = vpop.f32.mrb[35].mxu1 }
 0x146   : > { %v1647_v0 = vpack.c.bf16 %v1022_v58, %v1022_v58  ;;  %v1679_v1 = vpack.c.bf16 %v1054_v59, %v1054_v59  ;;  %v1023_v2 = vmax.f32 %v819_v60, 0.0  ;;  %v1055_v3 = vmax.f32 %v947_v61, 0.0 }
 0x148   : > { %1343 = vst.msk [vmem:[%s2016_s18 + $0x40] sm:$0xf] %vm1326_vm3, %v1647_v0  ;;  %1375 = vst.msk [vmem:[%s2016_s18 + $0xc0] sm:$0xf] %vm1326_vm3, %v1679_v1  ;;  %v1648_v4 = vpack.c.bf16 %v1023_v2, %v1023_v2  ;;  %v1680_v5 = vpack.c.bf16 %v1055_v3, %v1055_v3 }
 0x149   : > { %v823_v6 = vpop.f32.mrb[36].mxu0  ;;  %v951_v7 = vpop.f32.mrb[36].mxu1 }
 0x14a   : > { %1344 = vst.msk [vmem:[%s2016_s18 + $0x44] sm:$0xf] %vm1326_vm3, %v1648_v4  ;;  %1376 = vst.msk [vmem:[%s2016_s18 + $0xc4] sm:$0xf] %vm1326_vm3, %v1680_v5  ;;  %v824_v8 = vadd.f32 %v2006_v15, %v823_v6  ;;  %v952_v9 = vadd.f32 %v2006_v15, %v951_v7  ;;  %v825_v10 = vpop.f32.mrb[37].mxu0  ;;  %v953_v11 = vpop.f32.mrb[37].mxu1 }
 0x14b   : > { %v826_v12 = vpop.f32.mrb[38].mxu0  ;;  %v954_v13 = vpop.f32.mrb[38].mxu1 }
 0x14c   : > { %v1024_v14 = vmax.f32 %v824_v8, 0.0  ;;  %v1056_v16 = vmax.f32 %v952_v9, 0.0  ;;  %v827_v17 = vadd.f32 %v2006_v15, %v826_v12  ;;  %v955_v18 = vadd.f32 %v2006_v15, %v954_v13  ;;  %v828_v19 = vpop.f32.mrb[39].mxu0  ;;  %v956_v20 = vpop.f32.mrb[39].mxu1 }
 0x14e   : > { %v1649_v21 = vpack.c.bf16 %v1024_v14, %v1024_v14  ;;  %v1681_v22 = vpack.c.bf16 %v1056_v16, %v1056_v16  ;;  %v1025_v23 = vmax.f32 %v827_v17, 0.0  ;;  %v1057_v24 = vmax.f32 %v955_v18, 0.0 }
 0x150   : > { %1345 = vst.msk [vmem:[%s2016_s18 + $0x48] sm:$0xf] %vm1326_vm3, %v1649_v21  ;;  %1377 = vst.msk [vmem:[%s2016_s18 + $0xc8] sm:$0xf] %vm1326_vm3, %v1681_v22  ;;  %v1650_v25 = vpack.c.bf16 %v1025_v23, %v1025_v23  ;;  %v1682_v26 = vpack.c.bf16 %v1057_v24, %v1057_v24 }
 0x151   : > { %v831_v27 = vpop.f32.mrb[40].mxu0  ;;  %v959_v28 = vpop.f32.mrb[40].mxu1 }
 0x152   : > { %1346 = vst.msk [vmem:[%s2016_s18 + $0x4c] sm:$0xf] %vm1326_vm3, %v1650_v25  ;;  %1378 = vst.msk [vmem:[%s2016_s18 + $0xcc] sm:$0xf] %vm1326_vm3, %v1682_v26  ;;  %v832_v29 = vadd.f32 %v2006_v15, %v831_v27  ;;  %v960_v30 = vadd.f32 %v2006_v15, %v959_v28  ;;  %v833_v31 = vpop.f32.mrb[41].mxu0  ;;  %v961_v32 = vpop.f32.mrb[41].mxu1 }
 0x153   : > { %v834_v33 = vpop.f32.mrb[42].mxu0  ;;  %v962_v34 = vpop.f32.mrb[42].mxu1 }
 0x154   : > { %v1026_v35 = vmax.f32 %v832_v29, 0.0  ;;  %v1058_v36 = vmax.f32 %v960_v30, 0.0  ;;  %v835_v37 = vadd.f32 %v2006_v15, %v834_v33  ;;  %v963_v38 = vadd.f32 %v2006_v15, %v962_v34  ;;  %v836_v39 = vpop.f32.mrb[43].mxu0  ;;  %v964_v40 = vpop.f32.mrb[43].mxu1 }
 0x156   : > { %v1651_v41 = vpack.c.bf16 %v1026_v35, %v1026_v35  ;;  %v1683_v42 = vpack.c.bf16 %v1058_v36, %v1058_v36  ;;  %v1027_v43 = vmax.f32 %v835_v37, 0.0  ;;  %v1059_v44 = vmax.f32 %v963_v38, 0.0 }
 0x158   : > { %1347 = vst.msk [vmem:[%s2016_s18 + $0x50] sm:$0xf] %vm1326_vm3, %v1651_v41  ;;  %1379 = vst.msk [vmem:[%s2016_s18 + $0xd0] sm:$0xf] %vm1326_vm3, %v1683_v42  ;;  %v1652_v45 = vpack.c.bf16 %v1027_v43, %v1027_v43  ;;  %v1684_v46 = vpack.c.bf16 %v1059_v44, %v1059_v44 }
 0x159   : > { %v839_v47 = vpop.f32.mrb[44].mxu0  ;;  %v967_v48 = vpop.f32.mrb[44].mxu1 }
 0x15a   : > { %1348 = vst.msk [vmem:[%s2016_s18 + $0x54] sm:$0xf] %vm1326_vm3, %v1652_v45  ;;  %1380 = vst.msk [vmem:[%s2016_s18 + $0xd4] sm:$0xf] %vm1326_vm3, %v1684_v46  ;;  %v840_v49 = vadd.f32 %v2006_v15, %v839_v47  ;;  %v968_v50 = vadd.f32 %v2006_v15, %v967_v48  ;;  %v841_v51 = vpop.f32.mrb[45].mxu0  ;;  %v969_v52 = vpop.f32.mrb[45].mxu1 }
 0x15b   : > { %v842_v53 = vpop.f32.mrb[46].mxu0  ;;  %v970_v54 = vpop.f32.mrb[46].mxu1 }
 0x15c   : > { %v1028_v55 = vmax.f32 %v840_v49, 0.0  ;;  %v1060_v56 = vmax.f32 %v968_v50, 0.0  ;;  %v843_v57 = vadd.f32 %v2006_v15, %v842_v53  ;;  %v971_v58 = vadd.f32 %v2006_v15, %v970_v54  ;;  %v844_v59 = vpop.f32.mrb[47].mxu0  ;;  %v972_v60 = vpop.f32.mrb[47].mxu1 }
 0x15e   : > { %v1653_v61 = vpack.c.bf16 %v1028_v55, %v1028_v55  ;;  %v1685_v62 = vpack.c.bf16 %v1060_v56, %v1060_v56  ;;  %v1029_v63 = vmax.f32 %v843_v57, 0.0  ;;  %v1061_v0 = vmax.f32 %v971_v58, 0.0 }
 0x160   : > { %1349 = vst.msk [vmem:[%s2016_s18 + $0x58] sm:$0xf] %vm1326_vm3, %v1653_v61  ;;  %1381 = vst.msk [vmem:[%s2016_s18 + $0xd8] sm:$0xf] %vm1326_vm3, %v1685_v62  ;;  %v1654_v1 = vpack.c.bf16 %v1029_v63, %v1029_v63  ;;  %v1686_v2 = vpack.c.bf16 %v1061_v0, %v1061_v0 }
 0x161   : > { %v847_v3 = vpop.f32.mrb[48].mxu0  ;;  %v975_v4 = vpop.f32.mrb[48].mxu1 }
 0x162   : > { %1350 = vst.msk [vmem:[%s2016_s18 + $0x5c] sm:$0xf] %vm1326_vm3, %v1654_v1  ;;  %1382 = vst.msk [vmem:[%s2016_s18 + $0xdc] sm:$0xf] %vm1326_vm3, %v1686_v2  ;;  %v848_v5 = vadd.f32 %v2006_v15, %v847_v3  ;;  %v976_v6 = vadd.f32 %v2006_v15, %v975_v4  ;;  %v849_v7 = vpop.f32.mrb[49].mxu0  ;;  %v977_v8 = vpop.f32.mrb[49].mxu1 }
 0x163   : > { %v850_v9 = vpop.f32.mrb[50].mxu0  ;;  %v978_v10 = vpop.f32.mrb[50].mxu1 }
 0x164   : > { %v1030_v11 = vmax.f32 %v848_v5, 0.0  ;;  %v1062_v12 = vmax.f32 %v976_v6, 0.0  ;;  %v851_v13 = vadd.f32 %v2006_v15, %v850_v9  ;;  %v979_v14 = vadd.f32 %v2006_v15, %v978_v10  ;;  %v852_v16 = vpop.f32.mrb[51].mxu0  ;;  %v980_v17 = vpop.f32.mrb[51].mxu1 }
 0x166   : > { %v1655_v18 = vpack.c.bf16 %v1030_v11, %v1030_v11  ;;  %v1687_v19 = vpack.c.bf16 %v1062_v12, %v1062_v12  ;;  %v1031_v20 = vmax.f32 %v851_v13, 0.0  ;;  %v1063_v21 = vmax.f32 %v979_v14, 0.0 }
 0x168   : > { %1351 = vst.msk [vmem:[%s2016_s18 + $0x60] sm:$0xf] %vm1326_vm3, %v1655_v18  ;;  %1383 = vst.msk [vmem:[%s2016_s18 + $0xe0] sm:$0xf] %vm1326_vm3, %v1687_v19  ;;  %v1656_v22 = vpack.c.bf16 %v1031_v20, %v1031_v20  ;;  %v1688_v23 = vpack.c.bf16 %v1063_v21, %v1063_v21 }
 0x169   : > { %v855_v24 = vpop.f32.mrb[52].mxu0  ;;  %v983_v25 = vpop.f32.mrb[52].mxu1 }
 0x16a   : > { %1352 = vst.msk [vmem:[%s2016_s18 + $0x64] sm:$0xf] %vm1326_vm3, %v1656_v22  ;;  %1384 = vst.msk [vmem:[%s2016_s18 + $0xe4] sm:$0xf] %vm1326_vm3, %v1688_v23  ;;  %v856_v26 = vadd.f32 %v2006_v15, %v855_v24  ;;  %v984_v27 = vadd.f32 %v2006_v15, %v983_v25  ;;  %v857_v28 = vpop.f32.mrb[53].mxu0  ;;  %v985_v29 = vpop.f32.mrb[53].mxu1 }
 0x16b   : > { %v858_v30 = vpop.f32.mrb[54].mxu0  ;;  %v986_v31 = vpop.f32.mrb[54].mxu1 }
 0x16c   : > { %v1032_v32 = vmax.f32 %v856_v26, 0.0  ;;  %v1064_v33 = vmax.f32 %v984_v27, 0.0  ;;  %v859_v34 = vadd.f32 %v2006_v15, %v858_v30  ;;  %v987_v35 = vadd.f32 %v2006_v15, %v986_v31  ;;  %v860_v36 = vpop.f32.mrb[55].mxu0  ;;  %v988_v37 = vpop.f32.mrb[55].mxu1 }
 0x16e   : > { %v1657_v38 = vpack.c.bf16 %v1032_v32, %v1032_v32  ;;  %v1689_v39 = vpack.c.bf16 %v1064_v33, %v1064_v33  ;;  %v1033_v40 = vmax.f32 %v859_v34, 0.0  ;;  %v1065_v41 = vmax.f32 %v987_v35, 0.0 }
 0x170   : > { %1353 = vst.msk [vmem:[%s2016_s18 + $0x68] sm:$0xf] %vm1326_vm3, %v1657_v38  ;;  %1385 = vst.msk [vmem:[%s2016_s18 + $0xe8] sm:$0xf] %vm1326_vm3, %v1689_v39  ;;  %v1658_v42 = vpack.c.bf16 %v1033_v40, %v1033_v40  ;;  %v1690_v43 = vpack.c.bf16 %v1065_v41, %v1065_v41 }
 0x171   : > { %v863_v44 = vpop.f32.mrb[56].mxu0  ;;  %v991_v45 = vpop.f32.mrb[56].mxu1 }
 0x172   : > { %1354 = vst.msk [vmem:[%s2016_s18 + $0x6c] sm:$0xf] %vm1326_vm3, %v1658_v42  ;;  %1386 = vst.msk [vmem:[%s2016_s18 + $0xec] sm:$0xf] %vm1326_vm3, %v1690_v43  ;;  %v864_v46 = vadd.f32 %v2006_v15, %v863_v44  ;;  %v992_v47 = vadd.f32 %v2006_v15, %v991_v45  ;;  %v865_v48 = vpop.f32.mrb[57].mxu0  ;;  %v993_v49 = vpop.f32.mrb[57].mxu1 }
 0x173   : > { %v866_v50 = vpop.f32.mrb[58].mxu0  ;;  %v994_v51 = vpop.f32.mrb[58].mxu1 }
 0x174   : > { %v1034_v52 = vmax.f32 %v864_v46, 0.0  ;;  %v1066_v53 = vmax.f32 %v992_v47, 0.0  ;;  %v867_v54 = vadd.f32 %v2006_v15, %v866_v50  ;;  %v995_v55 = vadd.f32 %v2006_v15, %v994_v51  ;;  %v868_v56 = vpop.f32.mrb[59].mxu0  ;;  %v996_v57 = vpop.f32.mrb[59].mxu1 }
 0x176   : > { %v1659_v58 = vpack.c.bf16 %v1034_v52, %v1034_v52  ;;  %v1691_v59 = vpack.c.bf16 %v1066_v53, %v1066_v53  ;;  %v1035_v60 = vmax.f32 %v867_v54, 0.0  ;;  %v1067_v61 = vmax.f32 %v995_v55, 0.0 }
 0x178   : > { %1355 = vst.msk [vmem:[%s2016_s18 + $0x70] sm:$0xf] %vm1326_vm3, %v1659_v58  ;;  %1387 = vst.msk [vmem:[%s2016_s18 + $0xf0] sm:$0xf] %vm1326_vm3, %v1691_v59  ;;  %v1660_v62 = vpack.c.bf16 %v1035_v60, %v1035_v60  ;;  %v1692_v63 = vpack.c.bf16 %v1067_v61, %v1067_v61 }
 0x179   : > { %v871_v0 = vpop.f32.mrb[60].mxu0  ;;  %v999_v1 = vpop.f32.mrb[60].mxu1 }
 0x17a   : > { %1356 = vst.msk [vmem:[%s2016_s18 + $0x74] sm:$0xf] %vm1326_vm3, %v1660_v62  ;;  %1388 = vst.msk [vmem:[%s2016_s18 + $0xf4] sm:$0xf] %vm1326_vm3, %v1692_v63  ;;  %v872_v2 = vadd.f32 %v2006_v15, %v871_v0  ;;  %v1000_v3 = vadd.f32 %v2006_v15, %v999_v1  ;;  %v873_v4 = vpop.f32.mrb[61].mxu0  ;;  %v1001_v5 = vpop.f32.mrb[61].mxu1 }
 0x17b   : > { %v874_v6 = vpop.f32.mrb[62].mxu0  ;;  %v1002_v7 = vpop.f32.mrb[62].mxu1 }
 0x17c   : > { %v1036_v8 = vmax.f32 %v872_v2, 0.0  ;;  %v1068_v9 = vmax.f32 %v1000_v3, 0.0  ;;  %v875_v10 = vadd.f32 %v2006_v15, %v874_v6  ;;  %v1003_v11 = vadd.f32 %v2006_v15, %v1002_v7  ;;  %v876_v12 = vpop.f32.mrb[63].mxu0  ;;  %v1004_v13 = vpop.f32.mrb[63].mxu1 }
 0x17e   : > { %v1661_v14 = vpack.c.bf16 %v1036_v8, %v1036_v8  ;;  %v1693_v16 = vpack.c.bf16 %v1068_v9, %v1068_v9  ;;  %v1037_v17 = vmax.f32 %v875_v10, 0.0  ;;  %v1069_v18 = vmax.f32 %v1003_v11, 0.0 }
 0x180   : > { %1357 = vst.msk [vmem:[%s2016_s18 + $0x78] sm:$0xf] %vm1326_vm3, %v1661_v14  ;;  %1389 = vst.msk [vmem:[%s2016_s18 + $0xf8] sm:$0xf] %vm1326_vm3, %v1693_v16  ;;  %v1662_v19 = vpack.c.bf16 %v1037_v17, %v1037_v17  ;;  %v1694_v20 = vpack.c.bf16 %v1069_v18, %v1069_v18 }
 0x182   : > { %1358 = vst.msk [vmem:[%s2016_s18 + $0x7c] sm:$0xf] %vm1326_vm3, %v1662_v19  ;;  %1390 = vst.msk [vmem:[%s2016_s18 + $0xfc] sm:$0xf] %vm1326_vm3, %v1694_v20 }
 0x183 PF: > { %s13_s12 = sadd.s32 1, %s1837_s12  }
 0x184   : > { %p10_p4 = scmp.ge.s32.totalorder %s13_s12, 4  }
 0x186   :  { %12 = sbr.rel (!%p10_p4) target bundleno = 1 (0x1), region = 62 }

</bundles_post_ra>
